<compile_context>
chip_gen: v5e
topology: v5e:2x2
jax: 0.10.0
libtpu: 0.0.40
codegen_flags: <defaults>
</compile_context>

<pallas_src>
import functools

import jax
import jax.numpy as jnp
from jax.experimental import pallas as pl
from jax.experimental.pallas import tpu as pltpu

_LANE = 128                     # vreg lane width; batch tiles are multiples of this
_MIN_STEP_ROWS = 4096           # below this, a grid step is mostly fixed overhead
_MAX_STREAM_BYTES = 24 << 20    # cap on the double-buffered (x + out) streaming set
                                # (v7x has only 64 MiB VMEM per TensorCore)


def _round_up(n, m):
    return ((n + m - 1) // m) * m


def _cdiv(a, b):
    return -(-a // b)


def mlp_kernel(xT_ref, w1_ref, b1_ref, w2_ref, b2_ref, w3_ref, b3_ref, oT_ref):
    """One batch tile, fully fused: 3 MXU matmuls + VPU relu + EUP sigmoid.

    Lane-dense layout (batch on the 128-lane axis):
      xT_ref : [F, tb]     w*_ref : [out, in]   (compute dtype, usually bf16)
      b*_ref : [out, 1]    (f32)                oT_ref : [T, tb] (f32)
    Matmul operands may be bf16; accumulation, bias adds and activations are f32.
    """
    xT = xT_ref[...]
    h = jnp.dot(w1_ref[...], xT, preferred_element_type=jnp.float32) + b1_ref[...]
    h = jnp.maximum(h, 0.0)                                    # ReLU (f32, VPU)
    h = h.astype(w2_ref.dtype)                                 # keep MXU single-pass
    h = jnp.dot(w2_ref[...], h, preferred_element_type=jnp.float32) + b2_ref[...]
    h = jnp.maximum(h, 0.0)                                    # ReLU (f32, VPU)
    h = h.astype(w3_ref.dtype)
    z = jnp.dot(w3_ref[...], h, preferred_element_type=jnp.float32) + b3_ref[...]
    oT_ref[...] = jax.nn.sigmoid(z).astype(oT_ref.dtype)       # sigmoid (f32, EUP)


def mlp_forward_t(xT, params, *, batch_tile=65536):
    """Core fused MLP (the fast path).

    xT: [F, B] with the batch on the last (lane) axis -- the layout the kernel
    wants; producing it upstream avoids any extra HBM pass.  xT.dtype is the
    matmul compute dtype (bfloat16 recommended: it halves the dominant HBM read
    and keeps the MXU on its native single-pass path).  Weights (PyTorch [out,in]
    layout) are cast to xT.dtype; biases stay f32.

    Returns the lane-dense [T, B] float32 output.  No transpose back: fold any
    reorientation into the consumer (see mlp_forward for a convenience wrapper).
    """
    w1, b1, w2, b2, w3, b3 = params
    F, B = xT.shape
    H = w1.shape[0]
    T = w3.shape[0]
    cdt = xT.dtype
    x_item = jnp.dtype(cdt).itemsize

    # ---- batch tile ---------------------------------------------------------
    if B <= _LANE:
        tb = B                                      # single full-extent block
    else:
        # Largest 128-multiple <= min(requested, B): block never exceeds the array.
        tb = max(_LANE, (min(batch_tile, B) // _LANE) * _LANE)
        # Target >=4 grid steps once the batch is big enough to amortize the
        # ~0.35us per-step overhead -> >=2 steps per TensorCore under the
        # "parallel" batch axis on v7x megacore.
        if B >= 4 * _MIN_STEP_ROWS and _cdiv(B, tb) < 4:
            tb = max(_MIN_STEP_ROWS, _round_up(_cdiv(B, 4), _LANE))
            tb = min(tb, (B // _LANE) * _LANE)
        # v7x-safe VMEM cap: double-buffered x-in + out streaming set <= 24 MiB.
        per_row = F * x_item + T * 4
        tb_vmem = max(_LANE, (_MAX_STREAM_BYTES // (2 * per_row)) // _LANE * _LANE)
        tb = min(tb, tb_vmem)

    grid = (_cdiv(B, tb),)       # cdiv grid: last block is partial/masked if needed

    # Scoped-VMEM request: enough for the streaming double buffers (+ slack),
    # but never above 48 MiB so it stays safe inside v7x's 64 MiB per-TC VMEM.
    stream_bytes = 2 * tb * (F * x_item + T * 4)
    vmem_limit = int(min(48 << 20, max(32 << 20, 2 * stream_bytes)))

    cost = pl.CostEstimate(
        flops=int(2 * B * (F * H + H * H + H * T)),
        transcendentals=int(B * T),                            # sigmoid
        bytes_accessed=int(
            B * F * x_item                                     # x read
            + B * T * 4                                        # out write (f32)
            + (H * F + H * H + T * H) * x_item                 # weights
            + (2 * H + T) * 4                                  # biases (f32)
        ),
    )

    # Resident (constant-index) parameter blocks, ~3 KiB total, live in VMEM for
    # the whole grid.  (pl.Buffered(1) would single-buffer them; omitted -- the
    # saving is a few KiB and portability matters more.)
    resident = lambda shape: pl.BlockSpec(shape, lambda i: (0, 0))

    outT = pl.pallas_call(
        mlp_kernel,
        out_shape=jax.ShapeDtypeStruct((T, B), jnp.float32),
        grid_spec=pltpu.PrefetchScalarGridSpec(
            num_scalar_prefetch=0,
            grid=grid,
            in_specs=[
                pl.BlockSpec((F, tb), lambda i: (0, i)),       # x tile: batch on lanes
                resident((H, F)), resident((H, 1)),
                resident((H, H)), resident((H, 1)),
                resident((T, H)), resident((T, 1)),
            ],
            out_specs=pl.BlockSpec((T, tb), lambda i: (0, i)),  # lane-dense output
        ),
        compiler_params=pltpu.CompilerParams(
            dimension_semantics=("parallel",),   # megacore-shard batch on v7x
            vmem_limit_bytes=vmem_limit,
        ),
        cost_estimate=cost,
    )(xT, w1.astype(cdt), b1, w2.astype(cdt), b2, w3.astype(cdt), b3)

    return outT


def mlp_forward(x, params, *, batch_tile=65536, compute_dtype=jnp.bfloat16):
    """Convenience wrapper for PyTorch-style [B, F] inputs; returns [B, T] f32.

    NOTE: the transpose-to-lane-dense and the transpose-back are each a full HBM
    pass over x / the output.  The cast to compute_dtype is fused into the input
    transpose (so the materialized slab is half size for bf16), but for peak
    throughput produce x as [F, B] in compute_dtype upstream and call
    mlp_forward_t directly, consuming its [T, B] output as-is.
    """
    xT = x.astype(compute_dtype).T               # one fused cast+transpose pass
    return mlp_forward_t(xT, params, batch_tile=batch_tile).T


def init_mlp_params(key, num_features, intermediate_size, num_targets):
    """Deterministic Linear init (uniform +-1/sqrt(fan_in), like torch defaults).
    Weights are stored [out, in] (native PyTorch layout), biases [out, 1] (f32)."""
    def linear(k, fan_in, fan_out):
        kw, kb = jax.random.split(k)
        bound = 1.0 / jnp.sqrt(fan_in)
        w = jax.random.uniform(kw, (fan_out, fan_in), jnp.float32, -bound, bound)
        b = jax.random.uniform(kb, (fan_out, 1), jnp.float32, -bound, bound)
        return w, b

    k1, k2, k3 = jax.random.split(key, 3)
    w1, b1 = linear(k1, num_features, intermediate_size)
    w2, b2 = linear(k2, intermediate_size, intermediate_size)
    w3, b3 = linear(k3, intermediate_size, num_targets)
    return (w1, b1, w2, b2, w3, b3)


def mlp_reference(x, params):
    """Pure-JAX f32 reference for correctness checks (weights [out, in])."""
    w1, b1, w2, b2, w3, b3 = params
    h = jnp.maximum(x @ w1.T + b1[:, 0], 0.0)
    h = jnp.maximum(h @ w2.T + b2[:, 0], 0.0)
    return jax.nn.sigmoid(h @ w3.T + b3[:, 0])


if __name__ == "__main__":
    # Shapes consistent with the module: num_features=16, num_targets=4,
    # num_layers=3, intermediate_size=32.
    F, H, T = 16, 32, 4
    key = jax.random.PRNGKey(0)
    kx1, kx2, kp = jax.random.split(key, 3)
    params = init_mlp_params(kp, F, H, T)

    # 1) Tiny batch (B=8 < 128 -> single full-extent block), default bf16 compute.
    x1 = jax.random.normal(kx1, (8, F), jnp.float32)
    out1 = jax.block_until_ready(jax.jit(mlp_forward)(x1, params))
    ref1 = mlp_reference(x1, params)
    assert out1.shape == (8, T)
    assert float(jnp.max(jnp.abs(out1 - ref1))) < 3e-2, "bf16 path mismatch (small)"

    # 2) Ragged multi-tile batch: B=300 with 128-row tiles -> 3 grid steps, the
    #    last one a masked partial block (rows 256..299).  bf16 compute.
    x2 = jax.random.normal(kx2, (300, F), jnp.float32)
    fwd2 = jax.jit(functools.partial(mlp_forward, batch_tile=128))
    out2 = jax.block_until_ready(fwd2(x2, params))
    ref2 = mlp_reference(x2, params)
    assert out2.shape == (300, T)
    assert float(jnp.max(jnp.abs(out2 - ref2))) < 3e-2, "bf16 path mismatch (ragged)"

    # 3) Lane-dense core API ([F, B] in -> [T, B] out, no wrapper passes) in f32,
    #    with a 256-row tile so the 2nd block is partial too.
    xT3 = x2.T.astype(jnp.float32)
    fwd3 = jax.jit(functools.partial(mlp_forward_t, batch_tile=256))
    out3 = jax.block_until_ready(fwd3(xT3, params))
    assert out3.shape == (T, 300)
    assert float(jnp.max(jnp.abs(out3.T - ref2))) < 1e-3, "f32 core path mismatch"

    print("KERNEL_OK")
</pallas_src>

<mosaic_0001>
module attributes {stable_mosaic.version = 11 : i64} {
  func.func @mlp_kernel(%arg0: i32, %arg1: memref<16x8xbf16, #tpu.memory_space<vmem>>, %arg2: memref<32x16xbf16, #tpu.memory_space<vmem>>, %arg3: memref<32x1xf32, #tpu.memory_space<vmem>>, %arg4: memref<32x32xbf16, #tpu.memory_space<vmem>>, %arg5: memref<32x1xf32, #tpu.memory_space<vmem>>, %arg6: memref<4x32xbf16, #tpu.memory_space<vmem>>, %arg7: memref<4x1xf32, #tpu.memory_space<vmem>>, %arg8: memref<4x8xf32, #tpu.memory_space<vmem>>) attributes {dimension_semantics = [#tpu.dimension_semantics<parallel>], iteration_bounds = array<i64: 1>, scalar_prefetch = 0 : i64, scratch_operands = 0 : i64, tpu.core_type = #tpu.core_type<tc>, window_params = [{transform_indices = @transform_0, window_bounds = array<i64: 16, 8>}, {pipeline_mode = #tpu.pipeline_mode<synchronous>, transform_indices = @transform_1, window_bounds = array<i64: 32, 16>}, {pipeline_mode = #tpu.pipeline_mode<synchronous>, transform_indices = @transform_2, window_bounds = array<i64: 32, 1>}, {pipeline_mode = #tpu.pipeline_mode<synchronous>, transform_indices = @transform_3, window_bounds = array<i64: 32, 32>}, {pipeline_mode = #tpu.pipeline_mode<synchronous>, transform_indices = @transform_4, window_bounds = array<i64: 32, 1>}, {pipeline_mode = #tpu.pipeline_mode<synchronous>, transform_indices = @transform_5, window_bounds = array<i64: 4, 32>}, {pipeline_mode = #tpu.pipeline_mode<synchronous>, transform_indices = @transform_6, window_bounds = array<i64: 4, 1>}, {transform_indices = @transform_7, window_bounds = array<i64: 4, 8>}]} {
    %c0 = arith.constant 0 : index
    %c0_0 = arith.constant 0 : index
    %0 = vector.load %arg1[%c0, %c0_0] : memref<16x8xbf16, #tpu.memory_space<vmem>>, vector<16x8xbf16>
    %c0_1 = arith.constant 0 : index
    %c0_2 = arith.constant 0 : index
    %1 = vector.load %arg2[%c0_1, %c0_2] : memref<32x16xbf16, #tpu.memory_space<vmem>>, vector<32x16xbf16>
    %cst = arith.constant dense<0.000000e+00> : vector<32x8xf32>
    %2 = tpu.matmul %1, %0, %cst {dimension_numbers = #tpu.dot_dimension_numbers<[1], [0], [0], [1], [0, 0, 1, 1], [], []>} : vector<32x16xbf16>, vector<16x8xbf16>, vector<32x8xf32> -> vector<32x8xf32>
    %c0_3 = arith.constant 0 : index
    %c0_4 = arith.constant 0 : index
    %3 = vector.load %arg3[%c0_3, %c0_4] : memref<32x1xf32, #tpu.memory_space<vmem>>, vector<32x1xf32>
    %4 = vector.broadcast %3 : vector<32x1xf32> to vector<32x8xf32>
    %5 = arith.addf %2, %4 : vector<32x8xf32>
    %cst_5 = arith.constant 0.000000e+00 : f32
    %6 = vector.broadcast %cst_5 : f32 to vector<32x8xf32>
    %7 = arith.maximumf %5, %6 : vector<32x8xf32>
    %8 = arith.truncf %7 : vector<32x8xf32> to vector<32x8xbf16>
    %c0_6 = arith.constant 0 : index
    %c0_7 = arith.constant 0 : index
    %9 = vector.load %arg4[%c0_6, %c0_7] : memref<32x32xbf16, #tpu.memory_space<vmem>>, vector<32x32xbf16>
    %cst_8 = arith.constant dense<0.000000e+00> : vector<32x8xf32>
    %10 = tpu.matmul %9, %8, %cst_8 {dimension_numbers = #tpu.dot_dimension_numbers<[1], [0], [0], [1], [0, 0, 1, 1], [], []>} : vector<32x32xbf16>, vector<32x8xbf16>, vector<32x8xf32> -> vector<32x8xf32>
    %c0_9 = arith.constant 0 : index
    %c0_10 = arith.constant 0 : index
    %11 = vector.load %arg5[%c0_9, %c0_10] : memref<32x1xf32, #tpu.memory_space<vmem>>, vector<32x1xf32>
    %12 = vector.broadcast %11 : vector<32x1xf32> to vector<32x8xf32>
    %13 = arith.addf %10, %12 : vector<32x8xf32>
    %cst_11 = arith.constant 0.000000e+00 : f32
    %14 = vector.broadcast %cst_11 : f32 to vector<32x8xf32>
    %15 = arith.maximumf %13, %14 : vector<32x8xf32>
    %16 = arith.truncf %15 : vector<32x8xf32> to vector<32x8xbf16>
    %c0_12 = arith.constant 0 : index
    %c0_13 = arith.constant 0 : index
    %17 = vector.load %arg6[%c0_12, %c0_13] : memref<4x32xbf16, #tpu.memory_space<vmem>>, vector<4x32xbf16>
    %cst_14 = arith.constant dense<0.000000e+00> : vector<4x8xf32>
    %18 = tpu.matmul %17, %16, %cst_14 {dimension_numbers = #tpu.dot_dimension_numbers<[1], [0], [0], [1], [0, 0, 1, 1], [], []>} : vector<4x32xbf16>, vector<32x8xbf16>, vector<4x8xf32> -> vector<4x8xf32>
    %c0_15 = arith.constant 0 : index
    %c0_16 = arith.constant 0 : index
    %19 = vector.load %arg7[%c0_15, %c0_16] : memref<4x1xf32, #tpu.memory_space<vmem>>, vector<4x1xf32>
    %20 = vector.broadcast %19 : vector<4x1xf32> to vector<4x8xf32>
    %21 = arith.addf %18, %20 : vector<4x8xf32>
    %22 = arith.negf %21 : vector<4x8xf32>
    %23 = math.exp %22 : vector<4x8xf32>
    %cst_17 = arith.constant 1.000000e+00 : f32
    %24 = vector.broadcast %cst_17 : f32 to vector<4x8xf32>
    %25 = arith.addf %24, %23 : vector<4x8xf32>
    %26 = arith.divf %24, %25 : vector<4x8xf32>
    %c0_18 = arith.constant 0 : index
    %c0_19 = arith.constant 0 : index
    %27 = vector.load %arg8[%c0_18, %c0_19] : memref<4x8xf32, #tpu.memory_space<vmem>>, vector<4x8xf32>
    tpu.vector_store %arg8[%c0_18, %c0_19], %26 {strides = array<i32>} : memref<4x8xf32, #tpu.memory_space<vmem>>, vector<4x8xf32>,
    return
  }
  func.func @transform_0(%arg0: i32) -> (i32, i32) {
    %c0_i32 = arith.constant 0 : i32
    %c0_i32_0 = arith.constant 0 : i32
    return %c0_i32, %arg0 : i32, i32
  }
  func.func @transform_1(%arg0: i32) -> (i32, i32) {
    %c0_i32 = arith.constant 0 : i32
    %c0_i32_0 = arith.constant 0 : i32
    %c0_i32_1 = arith.constant 0 : i32
    return %c0_i32, %c0_i32_0 : i32, i32
  }
  func.func @transform_2(%arg0: i32) -> (i32, i32) {
    %c0_i32 = arith.constant 0 : i32
    %c0_i32_0 = arith.constant 0 : i32
    %c0_i32_1 = arith.constant 0 : i32
    return %c0_i32, %c0_i32_0 : i32, i32
  }
  func.func @transform_3(%arg0: i32) -> (i32, i32) {
    %c0_i32 = arith.constant 0 : i32
    %c0_i32_0 = arith.constant 0 : i32
    %c0_i32_1 = arith.constant 0 : i32
    return %c0_i32, %c0_i32_0 : i32, i32
  }
  func.func @transform_4(%arg0: i32) -> (i32, i32) {
    %c0_i32 = arith.constant 0 : i32
    %c0_i32_0 = arith.constant 0 : i32
    %c0_i32_1 = arith.constant 0 : i32
    return %c0_i32, %c0_i32_0 : i32, i32
  }
  func.func @transform_5(%arg0: i32) -> (i32, i32) {
    %c0_i32 = arith.constant 0 : i32
    %c0_i32_0 = arith.constant 0 : i32
    %c0_i32_1 = arith.constant 0 : i32
    return %c0_i32, %c0_i32_0 : i32, i32
  }
  func.func @transform_6(%arg0: i32) -> (i32, i32) {
    %c0_i32 = arith.constant 0 : i32
    %c0_i32_0 = arith.constant 0 : i32
    %c0_i32_1 = arith.constant 0 : i32
    return %c0_i32, %c0_i32_0 : i32, i32
  }
  func.func @transform_7(%arg0: i32) -> (i32, i32) {
    %c0_i32 = arith.constant 0 : i32
    %c0_i32_0 = arith.constant 0 : i32
    return %c0_i32, %arg0 : i32, i32
  }
}

</mosaic_0001>

<bundles_post_ra>
// kernel: mlp_forward.1
= control target key start
LH: loop header
LB: loop body
LE: loop exit
PB: predicated region body
PF: predicated region fallthrough
CT: control target
= control target key end

     0   :  { %v304_v3 = vmov 0   ;;  %vm74_vm0 = vcmask 130048   ;;  %s397_s0 = inlined_call_operand.vmem [shape: bf16[16,8], index: 0, kind: input, shape index: {}]   ;;  %s398_s1 = inlined_call_operand.vmem [shape: bf16[32,16], index: 1, kind: input, shape index: {}]   ;;  %s399_s2 = inlined_call_operand.vmem [shape: f32[32,1], index: 2, kind: input, shape index: {}]   ;;  %s400_s3 = inlined_call_operand.vmem [shape: bf16[32,32], index: 3, kind: input, shape index: {}]   ;;  %s401_s4 = inlined_call_operand.vmem [shape: f32[32,1], index: 4, kind: input, shape index: {}]   ;;  %s402_s5 = inlined_call_operand.vmem [shape: bf16[4,32], index: 5, kind: input, shape index: {}]   ;;  %s403_s6 = inlined_call_operand.vmem [shape: f32[4,1], index: 6, kind: input, shape index: {}]   ;;  %s404_s7 = inlined_call_operand.hbm [shape: f32[4,8], index: 7, kind: output, shape index: {}]  }
   0x1   :  { %v262_v0 = vld [vmem:[%s397_s0] sm:$0xff]  ;;  %v36_v1 = vld [vmem:[%s399_s2 + $0x10] sm:$0xff]  ;;  %272 = vset.pattern.permute.xlu1 %v304_v3  ;;  %271 = vset.pattern.permute.xlu0 %v304_v3 }
   0x2   :  { %v263_v2 = vld [vmem:[%s398_s1] sm:$0xff]  ;;  %88 = vmatpush.bf16.msra.mxu0 %v262_v0  ;;  %50 = vperm.xlu0 %271, %v36_v1  }
   0x3   :  { %v34_v4 = vld [vmem:[%s399_s2] sm:$0xff]  ;;  %273 = vset.pattern.permute.xlu2 %v304_v3 }
   0x4   :  { %40 = vperm.xlu1 %272, %v34_v4  }
   0x5   :  { %12 = vsyncpa [#allocation3], 0  ;;  %248 = vmatmul.msk.bf16.vlgmr.msra.gmra.mxu0 %vm74_vm0, %v263_v2  ;;  %v37_v5 = vld [vmem:[%s399_s2 + $0x18] sm:$0xff]  ;;  %v35_v6 = vld [vmem:[%s399_s2 + $0x8] sm:$0xff]  ;;  %vm144_vm1 = vcmask 261120   ;;  %s305_s25 = smov [#allocation2]  }
   0x6   :  { %v110_v7 = vld [vmem:[%s401_s4] sm:$0xff]  ;;  %v111_v8 = vld [vmem:[%s401_s4 + $0x8] sm:$0xff]  ;;  %v112_v11 = vld [vmem:[%s401_s4 + $0x10] sm:$0xff]  ;;  %s227_s28 = sshll.u32 %s404_s7, 4  ;;  %vm218_vm5 = vcmask 60416   ;;  %s228_s28 = int_to_ptr.hbm [resolvable:$true] %s227_s28 }
   0x7   :  { %v264_v9 = vld [vmem:[%s398_s1 + $0x8] sm:$0xff]  ;;  %126 = vperm.xlu2 %273, %v112_v11   ;;  %v113_v14 = vld [vmem:[%s401_s4 + $0x18] sm:$0xff]  ;;  %v177_v17 = vld [vmem:[%s403_s6] sm:$0xf] }
   0x8   :  { %v265_v31 = vld [vmem:[%s400_s3] sm:$0xff]  ;;  %v266_v32 = vld [vmem:[%s400_s3 + $0x8] sm:$0xff] }
   0x9   :  { %v176_v51 = vld [vmem:[%s402_s5] sm:$0x3]  ;;  %s225_s5 = sshll.u32 %s305_s25, 4  ;;  %s226_s5 = int_to_ptr.vmem [resolvable:$true] %s225_s5 }
   0xa   :  { %55 = vperm.xlu0 %271, %v37_v5  }
   0xc   :  { %45 = vperm.xlu1 %272, %v35_v6  }
   0xf   :  { %131 = vperm.xlu2 %273, %v113_v14  }
  0x12   :  { %116 = vperm.xlu0 %271, %v110_v7  }
  0x14   :  { %121 = vperm.xlu1 %272, %v111_v8  }
  0x15   :  { %249 = vmatmul.msk.bf16.gmra.mxu0 %vm74_vm0, %v264_v9 }
  0x17   :  { %180 = vperm.xlu2 %273, %v177_v17  }
  0x61   :  { %v127_v34 = vpop.permute.xlu2 %126 }
  0x69   :  { %v132_v39 = vpop.permute.xlu2 %131 }
  0x71   :  { %v181_v52 = vpop.permute.xlu2 %180 }
  0x74   :  { %v51_v15 = vpop.permute.xlu0 %50 }
  0x76   :  { %v41_v13 = vpop.permute.xlu1 %40 }
  0x7c   :  { %v56_v20 = vpop.permute.xlu0 %55 }
  0x7e   :  { %v46_v18 = vpop.permute.xlu1 %45 }
  0x82   :  { %v90_v10 = vpop.f32.mrf.mxu0 }
  0x83   :  { %v91_v24 = vadd.f32 %v90_v10, %v41_v13 }
  0x84   :  { %v117_v43 = vpop.permute.xlu0 %116 }
  0x85   :  { %v100_v29 = vmax.f32 %v91_v24, 0.0 }
  0x86   :  { %v122_v37 = vpop.permute.xlu1 %121 }
  0x8a   :  { %v92_v12 = vpop.f32.mrf.mxu0 }
  0x8b   :  { %v93_v22 = vadd.f32 %v92_v12, %v46_v18 }
  0x8d   :  { %v101_v27 = vmax.f32 %v93_v22, 0.0 }
  0x8f   :  { %v104_v30 = vpack.c.bf16 %v101_v27, %v100_v29 }
  0x92   :  { %v95_v16 = vpop.f32.mrf.mxu0 }
  0x93   :  { %v96_v19 = vadd.f32 %v95_v16, %v51_v15 }
  0x95   :  { %v102_v25 = vmax.f32 %v96_v19, 0.0 }
  0x9a   :  { %v97_v21 = vpop.f32.mrf.mxu0 }
  0x9b   :  { %v98_v23 = vadd.f32 %v97_v21, %v56_v20 }
  0x9d   :  { %v103_v26 = vmax.f32 %v98_v23, 0.0 }
  0x9f   :  { %v105_v28 = vpack.c.bf16 %v103_v26, %v102_v25 }
  0xa1   :  { %157 = vmatpush.bf16.msra.mxu1 %v105_v28  ;;  %267 = vmatpush.bf16.msra.mxu3 %v105_v28 }
  0xa5   :  { %158 = vmatpush.bf16.msra.mxu1 %v104_v30  ;;  %268 = vmatpush.bf16.msra.mxu3 %v104_v30 }
  0xa8   :  { %258 = vmatmul.msk.bf16.vlgmr.msra.gmra.mxu1 %vm144_vm1, %v265_v31  ;;  %259 = vmatmul.msk.bf16.vlgmr.msra.gmra.mxu3 %vm144_vm1, %v266_v32 }
 0x125   :  { %v160_v33 = vpop.f32.mrf.mxu1 }
 0x126   :  { %v161_v44 = vadd.f32 %v160_v33, %v117_v43 }
 0x128   :  { %v170_v49 = vmax.f32 %v161_v44, 0.0 }
 0x12b   :  { %v165_v35 = vpop.f32.mrf.mxu3 }
 0x12c   :  { %v166_v38 = vadd.f32 %v165_v35, %v127_v34 }
 0x12d   :  { %v162_v36 = vpop.f32.mrf.mxu1 }
 0x12e   :  { %v163_v41 = vadd.f32 %v162_v36, %v122_v37  ;;  %v172_v45 = vmax.f32 %v166_v38, 0.0 }
 0x130   :  { %v171_v47 = vmax.f32 %v163_v41, 0.0 }
 0x132   :  { %v174_v50 = vpack.c.bf16 %v171_v47, %v170_v49 }
 0x133   :  { %v167_v40 = vpop.f32.mrf.mxu3 }
 0x134   :  { %v168_v42 = vadd.f32 %v167_v40, %v132_v39 }
 0x136   :  { %v173_v46 = vmax.f32 %v168_v42, 0.0 }
 0x138   :  { %v175_v48 = vpack.c.bf16 %v173_v46, %v172_v45 }
 0x13a   :  { %192 = vmatpush.bf16.msra.mxu2 %v175_v48 }
 0x13e   :  { %193 = vmatpush.bf16.msra.mxu2 %v174_v50 }
 0x141   :  { %260 = vmatmul.msk.bf16.vlgmr.msra.gmra.mxu2 %vm144_vm1, %v176_v51 }
 0x1c4   :  { %v195_v53 = vpop.f32.mrf.mxu2 }
 0x1c5   :  { %v196_v54 = vadd.f32 %v195_v53, %v181_v52 }
 0x1c7   :  { %v261_v55 = vmul.f32 -1.442695, %v196_v54 }
 0x1c9   :  { %274 = vpow2.f32 %v261_v55 }
 0x1cc   :  { %v197_v56 = vpop.f32.mrf.mxu2 }
 0x1cf   :  { %v275_v57 = vpop.eup %274 }
 0x1d0   :  { %v202_v58 = vadd.f32 1.0, %v275_v57 }
 0x1d2   :  { %276 = vrcp.f32 %v202_v58  ;;  %v214_v62 = vand.u32 2147483648, %v202_v58  ;;  %v212_v0 = vand.u32 2147483647, %v202_v58  ;;  %vm208_vm3 = vweird.f32 %v202_v58 }
 0x1d4   :  { %v215_v2 = vor.u32 1.1754944e-38, %v214_v62  ;;  %vm213_vm6 = vcmp.eq.f32.partialorder %v212_v0, 8.507059e+37 }
 0x1d8   :  { %v277_v59 = vpop.eup %276 }
 0x1d9   :  { %v204_v60 = vmul.f32 %v277_v59, %v202_v58  ;;  %vm209_vm2 = vweird.f32 %v277_v59 }
 0x1da   :  { %vm210_vm4 = vmor %vm208_vm3, %vm209_vm2 }
 0x1db   :  { %v205_v61 = vsub.f32 1.0, %v204_v60 }
 0x1dd   :  { %v206_v63 = vmul.f32 %v277_v59, %v205_v61 }
 0x1df   :  { %v207_v1 = vadd.f32 %v277_v59, %v206_v63 }
 0x1e1   :  { %v211_v3 = vsel %vm210_vm4, %v277_v59, %v207_v1 }
 0x1e2   :  { %v216_v4 = vsel %vm213_vm6, %v215_v2, %v211_v3 }
 0x1e3   :  { %219 = vst.msk [vmem:[#allocation2] sm:$0xf] %vm218_vm5, %v216_v4 }
 0x1e4   :  { %230 = dma.vmem_to_hbm [thread:$0]  %s226_s5, 64, %s228_s28, [#allocation3]  }
 0x1e5   :  { %302 = dma.done.wait [#allocation3], 64  }
 0x1e6   :  { %303 = vsyncadd [#allocation3], 4294967232 }
 0x1e7   :  { %235 = vsyncpa [#allocation3], 1 }

</bundles_post_ra>
